<compile_context>
chip_gen: v7x
topology: tpu7x:2x2x1
jax: 0.10.0
libtpu: 0.0.40
codegen_flags: <defaults>
</compile_context>

<pallas_src>
import functools
import math

import jax
import jax.numpy as jnp
from jax import lax
from jax.experimental import pallas as pl
from jax.experimental.pallas import tpu as pltpu

_LOW_THRESHOLD = 0.1
_HIGH_THRESHOLD = 0.2
_EPS = 1e-6
_TAN_22_5 = 0.41421356237309503   # tan(22.5 deg)
_TAN_67_5 = 2.414213562373095     # tan(67.5 deg)
_LANE = 128
_GUARD = 2                        # zero columns between the x and y sub-planes


def _gauss_taps():
    # kornia gaussian kernel, size 5, sigma 1 (normalized, symmetric).
    g = [math.exp(-(i * i) / 2.0) for i in (-2, -1, 0, 1, 2)]
    z = sum(g)
    return g[0] / z, g[1] / z, g[2] / z


def _vmem_limit_bytes(h, kp):
    try:
        cap = int(pltpu.get_tpu_info().vmem_capacity_bytes)
    except Exception:                     # unknown device / interpret mode
        cap = 64 * 1024 * 1024            # v7x per-core floor
    plane = 4 * h * kp                    # one f32 (H, KP) working plane
    est = 4 * plane + 40 * plane + (4 << 20)   # dbl-buffered slab + live planes
    return int(min(max(est, 32 << 20), int(cap * 0.9)))


def _to_gray(img):
    c = img.shape[1]
    if c == 3:
        wts = jnp.asarray([0.299, 0.587, 0.114], jnp.float32).reshape(1, 3, 1, 1)
        return jnp.sum(img * wts, axis=1)
    if c == 1:
        return img[:, 0]
    raise ValueError("CannyLoss expects 1- or 3-channel NCHW inputs")


# ----------------------------------------------------------------------------
# Pallas kernel: joint Canny on the x|y slab + per-image squared-error partial.
# ----------------------------------------------------------------------------
def _canny_loss_kernel(xy_ref, out_ref, *, width, guard, g_taps, dilate_steps):
    f32 = jnp.float32
    w = width
    g0, g1, g2 = g_taps
    gray = xy_ref[...][0]                 # (H, KP): [0:w]=x, [w+guard:w+guard+w]=y, rest 0
    h, kp = gray.shape
    y_off = w + guard

    # ---- hoisted broadcastable masks ((H,1) / (1,KP), not full planes) ------
    row_i = lax.broadcasted_iota(jnp.int32, (h, 1), 0)
    col_i = lax.broadcasted_iota(jnp.int32, (1, kp), 1)

    r_first = (row_i == 0).astype(f32)
    r_last = (row_i == h - 1).astype(f32)
    r_edge2 = ((row_i == 1) | (row_i == h - 2)).astype(f32)
    rmask = {-2: (row_i >= 2), -1: (row_i >= 1),
             1: (row_i < h - 1), 2: (row_i < h - 2)}
    rmask = {d: m.astype(f32) for d, m in rmask.items()}

    c_first = ((col_i == 0) | (col_i == y_off)).astype(f32)
    c_last = ((col_i == w - 1) | (col_i == y_off + w - 1)).astype(f32)
    c_edge2 = ((col_i == 1) | (col_i == y_off + 1)
               | (col_i == w - 2) | (col_i == y_off + w - 2)).astype(f32)
    m_valid = ((col_i < w) | ((col_i >= y_off) & (col_i < y_off + w))).astype(f32)
    m_x = (col_i < w).astype(f32)

    # ---- shifted reads -------------------------------------------------------
    def sh_rows(a, d):        # a[i+d, j]; rows outside [0, H) read zero
        return pltpu.roll(a, (-d) % h, 0) * rmask[d]

    def sh_cols(a, d):        # a[i, j+d]; zero guard/tail columns provide zeros
        return pltpu.roll(a, (-d) % kp, 1)

    # ---- separable convs: roll + FMA, boundary-corrected --------------------
    def gauss5(a, sh, m_first, m_last, m_edge2):        # reflect border
        p1, n1 = sh(a, 1), sh(a, -1)
        p2, n2 = sh(a, 2), sh(a, -2)
        out = g2 * a + g1 * (p1 + n1) + g0 * (p2 + n2)
        out = out + m_first * (g1 * p1 + g0 * p2)
        out = out + m_last * (g1 * n1 + g0 * n2)
        return out + m_edge2 * (g0 * a)

    def smooth3(a, sh, m_first, m_last):                # [1,2,1], replicate
        return 2.0 * a + sh(a, 1) + sh(a, -1) + (m_first + m_last) * a

    def diff3(a, sh, m_first, m_last):                  # [-1,0,1], replicate
        return sh(a, 1) - sh(a, -1) + (m_last - m_first) * a

    # Gaussian blur 5x5 sigma=1 (reflect); re-zero guard/tail columns so the
    # following lane rolls keep pulling zeros across sub-plane boundaries.
    blurred = gauss5(gauss5(gray, sh_rows, r_first, r_last, r_edge2),
                     sh_cols, c_first, c_last, c_edge2) * m_valid
    # Un-normalized Sobel gradients (replicate border), as in kornia.canny.
    gx = diff3(smooth3(blurred, sh_rows, r_first, r_last), sh_cols, c_first, c_last)
    gy = smooth3(diff3(blurred, sh_rows, r_first, r_last), sh_cols, c_first, c_last)

    mag = jnp.sqrt(gx * gx + gy * gy + _EPS) * m_valid

    # ---- non-maximum suppression (fused 4-way direction select) -------------
    def up(a):    return sh_rows(a, -1)
    def down(a):  return sh_rows(a, 1)
    def left(a):  return sh_cols(a, -1)
    def right(a): return sh_cols(a, 1)

    mag_up, mag_dn = up(mag), down(mag)
    pm_h = jnp.maximum(right(mag), left(mag))            # 0 / 180 deg
    pm_v = jnp.maximum(mag_dn, mag_up)                   # 90 / 270 deg
    pm_d1 = jnp.maximum(right(mag_dn), left(mag_up))     # 45 / 225 deg
    pm_d2 = jnp.maximum(left(mag_dn), right(mag_up))     # 135 / 315 deg

    ax, ay = jnp.abs(gx), jnp.abs(gy)
    horiz = ay <= _TAN_22_5 * ax
    vert = ay >= _TAN_67_5 * ax
    diag = jnp.where((gy > 0) == (gx > 0), pm_d1, pm_d2)
    pm = jnp.where(horiz, pm_h, jnp.where(vert, pm_v, diag))
    mag = mag * (mag > pm).astype(f32)

    # ---- double threshold ----------------------------------------------------
    high = (mag > _HIGH_THRESHOLD).astype(f32)
    weak = (mag > _LOW_THRESHOLD).astype(f32) - high      # 0/1, loop invariant

    # ---- hysteresis: grow strong into 8-connected weak until fixpoint -------
    def dilate(s):
        v = s + up(s) + down(s)
        nbrs = v + left(v) + right(v) - s                 # strong 8-neighbour sum
        return jnp.maximum(s, weak * (nbrs > 0.5).astype(f32))

    def cond(carry):
        _, prev_cnt, cnt = carry
        return cnt > prev_cnt                             # monotone growth => exact

    def body(carry):
        s, _, cnt = carry
        for _ in range(dilate_steps):                     # trace-time unroll
            s = dilate(s)
        return s, cnt, jnp.sum(s)

    strong, _, _ = lax.while_loop(
        cond, body, (high, jnp.asarray(-1.0, f32), jnp.sum(high)))

    # ---- per-image sum of squared differences between the x / y edge maps ---
    dd = (strong - sh_cols(strong, y_off)) * m_x
    out_ref[...] = jnp.sum(dd * dd).reshape(1, 1, 1)


@jax.jit
def canny_loss(x, y):
    """MSE(canny_edges(x), canny_edges(y)) — forward of the PyTorch CannyLoss."""
    b, _, h, w = x.shape
    assert h >= 4 and w >= 4, "Canny needs spatial dims >= 4"
    gray_x = _to_gray(x.astype(jnp.float32))              # (B, H, W)
    gray_y = _to_gray(y.astype(jnp.float32))

    kp = max(_LANE, ((2 * w + 2 * _GUARD + _LANE - 1) // _LANE) * _LANE)
    slab = jnp.concatenate(
        [gray_x,
         jnp.zeros((b, h, _GUARD), jnp.float32),
         gray_y,
         jnp.zeros((b, h, kp - 2 * w - _GUARD), jnp.float32)],
        axis=-1)                                          # (B, H, KP)

    kernel = functools.partial(
        _canny_loss_kernel, width=w, guard=_GUARD, g_taps=_gauss_taps(),
        dilate_steps=4 if h * kp <= 256 * 512 else 2)

    per_image = pl.pallas_call(
        kernel,
        out_shape=jax.ShapeDtypeStruct((b, 1, 1), jnp.float32),
        grid_spec=pltpu.PrefetchScalarGridSpec(
            num_scalar_prefetch=0,
            grid=(b,),
            in_specs=[pl.BlockSpec((1, h, kp), lambda i: (i, 0, 0))],
            out_specs=pl.BlockSpec((1, 1, 1), lambda i: (i, 0, 0)),
        ),
        compiler_params=pltpu.CompilerParams(
            dimension_semantics=("parallel",),
            vmem_limit_bytes=_vmem_limit_bytes(h, kp),
        ),
    )(slab)
    return jnp.sum(per_image) / (b * h * w)


if __name__ == "__main__":
    key = jax.random.PRNGKey(0)
    kx, ky = jax.random.split(key)
    x = jax.random.uniform(kx, (2, 3, 16, 16), dtype=jnp.float32)
    y = jax.random.uniform(ky, (2, 3, 16, 16), dtype=jnp.float32)
    loss = canny_loss(x, y)
    jax.block_until_ready(loss)
    print("KERNEL_OK")
</pallas_src>

<mosaic_0001>
module attributes {stable_mosaic.version = 11 : i64} {
  func.func @_canny_loss_kernel(%arg0: i32, %arg1: memref<1x16x128xf32, #tpu.memory_space<vmem>>, %arg2: memref<1x1x1xf32, #tpu.memory_space<vmem>>) attributes {dimension_semantics = [#tpu.dimension_semantics<parallel>], iteration_bounds = array<i64: 2>, scalar_prefetch = 0 : i64, scratch_operands = 0 : i64, tpu.core_type = #tpu.core_type<tc>, window_params = [{transform_indices = @transform_0, window_bounds = array<i64: 1, 16, 128>}, {transform_indices = @transform_1, window_bounds = array<i64: 1, 1, 1>}]} {
    %c0 = arith.constant 0 : index
    %c0_0 = arith.constant 0 : index
    %c0_1 = arith.constant 0 : index
    %0 = vector.load %arg1[%c0, %c0_0, %c0_1] : memref<1x16x128xf32, #tpu.memory_space<vmem>>, vector<1x16x128xf32>
    %1 = vector.shape_cast %0 : vector<1x16x128xf32> to vector<16x128xf32>
    %2 = tpu.iota {dimensions = array<i32: 0>} : vector<16x1xi32>
    %3 = tpu.iota {dimensions = array<i32: 1>} : vector<1x128xi32>
    %c0_i32 = arith.constant 0 : i32
    %4 = vector.broadcast %c0_i32 : i32 to vector<16x1xi32>
    %5 = arith.cmpi eq, %2, %4 : vector<16x1xi32>
    %6 = arith.extui %5 : vector<16x1xi1> to vector<16x1xi32>
    %7 = arith.sitofp %6 : vector<16x1xi32> to vector<16x1xf32>
    %c15_i32 = arith.constant 15 : i32
    %8 = vector.broadcast %c15_i32 : i32 to vector<16x1xi32>
    %9 = arith.cmpi eq, %2, %8 : vector<16x1xi32>
    %10 = arith.extui %9 : vector<16x1xi1> to vector<16x1xi32>
    %11 = arith.sitofp %10 : vector<16x1xi32> to vector<16x1xf32>
    %c1_i32 = arith.constant 1 : i32
    %12 = vector.broadcast %c1_i32 : i32 to vector<16x1xi32>
    %13 = arith.cmpi eq, %2, %12 : vector<16x1xi32>
    %c14_i32 = arith.constant 14 : i32
    %14 = vector.broadcast %c14_i32 : i32 to vector<16x1xi32>
    %15 = arith.cmpi eq, %2, %14 : vector<16x1xi32>
    %16 = arith.ori %13, %15 : vector<16x1xi1>
    %17 = arith.extui %16 : vector<16x1xi1> to vector<16x1xi32>
    %18 = arith.sitofp %17 : vector<16x1xi32> to vector<16x1xf32>
    %c2_i32 = arith.constant 2 : i32
    %19 = vector.broadcast %c2_i32 : i32 to vector<16x1xi32>
    %20 = arith.cmpi sge, %2, %19 : vector<16x1xi32>
    %c1_i32_2 = arith.constant 1 : i32
    %21 = vector.broadcast %c1_i32_2 : i32 to vector<16x1xi32>
    %22 = arith.cmpi sge, %2, %21 : vector<16x1xi32>
    %c15_i32_3 = arith.constant 15 : i32
    %23 = vector.broadcast %c15_i32_3 : i32 to vector<16x1xi32>
    %24 = arith.cmpi slt, %2, %23 : vector<16x1xi32>
    %c14_i32_4 = arith.constant 14 : i32
    %25 = vector.broadcast %c14_i32_4 : i32 to vector<16x1xi32>
    %26 = arith.cmpi slt, %2, %25 : vector<16x1xi32>
    %27 = arith.extui %20 : vector<16x1xi1> to vector<16x1xi32>
    %28 = arith.sitofp %27 : vector<16x1xi32> to vector<16x1xf32>
    %29 = arith.extui %22 : vector<16x1xi1> to vector<16x1xi32>
    %30 = arith.sitofp %29 : vector<16x1xi32> to vector<16x1xf32>
    %31 = arith.extui %24 : vector<16x1xi1> to vector<16x1xi32>
    %32 = arith.sitofp %31 : vector<16x1xi32> to vector<16x1xf32>
    %33 = arith.extui %26 : vector<16x1xi1> to vector<16x1xi32>
    %34 = arith.sitofp %33 : vector<16x1xi32> to vector<16x1xf32>
    %c0_i32_5 = arith.constant 0 : i32
    %35 = vector.broadcast %c0_i32_5 : i32 to vector<1x128xi32>
    %36 = arith.cmpi eq, %3, %35 : vector<1x128xi32>
    %c18_i32 = arith.constant 18 : i32
    %37 = vector.broadcast %c18_i32 : i32 to vector<1x128xi32>
    %38 = arith.cmpi eq, %3, %37 : vector<1x128xi32>
    %39 = arith.ori %36, %38 : vector<1x128xi1>
    %40 = arith.extui %39 : vector<1x128xi1> to vector<1x128xi32>
    %41 = arith.sitofp %40 : vector<1x128xi32> to vector<1x128xf32>
    %c15_i32_6 = arith.constant 15 : i32
    %42 = vector.broadcast %c15_i32_6 : i32 to vector<1x128xi32>
    %43 = arith.cmpi eq, %3, %42 : vector<1x128xi32>
    %c33_i32 = arith.constant 33 : i32
    %44 = vector.broadcast %c33_i32 : i32 to vector<1x128xi32>
    %45 = arith.cmpi eq, %3, %44 : vector<1x128xi32>
    %46 = arith.ori %43, %45 : vector<1x128xi1>
    %47 = arith.extui %46 : vector<1x128xi1> to vector<1x128xi32>
    %48 = arith.sitofp %47 : vector<1x128xi32> to vector<1x128xf32>
    %c1_i32_7 = arith.constant 1 : i32
    %49 = vector.broadcast %c1_i32_7 : i32 to vector<1x128xi32>
    %50 = arith.cmpi eq, %3, %49 : vector<1x128xi32>
    %c19_i32 = arith.constant 19 : i32
    %51 = vector.broadcast %c19_i32 : i32 to vector<1x128xi32>
    %52 = arith.cmpi eq, %3, %51 : vector<1x128xi32>
    %53 = arith.ori %50, %52 : vector<1x128xi1>
    %c14_i32_8 = arith.constant 14 : i32
    %54 = vector.broadcast %c14_i32_8 : i32 to vector<1x128xi32>
    %55 = arith.cmpi eq, %3, %54 : vector<1x128xi32>
    %56 = arith.ori %53, %55 : vector<1x128xi1>
    %c32_i32 = arith.constant 32 : i32
    %57 = vector.broadcast %c32_i32 : i32 to vector<1x128xi32>
    %58 = arith.cmpi eq, %3, %57 : vector<1x128xi32>
    %59 = arith.ori %56, %58 : vector<1x128xi1>
    %60 = arith.extui %59 : vector<1x128xi1> to vector<1x128xi32>
    %61 = arith.sitofp %60 : vector<1x128xi32> to vector<1x128xf32>
    %c16_i32 = arith.constant 16 : i32
    %62 = vector.broadcast %c16_i32 : i32 to vector<1x128xi32>
    %63 = arith.cmpi slt, %3, %62 : vector<1x128xi32>
    %c18_i32_9 = arith.constant 18 : i32
    %64 = vector.broadcast %c18_i32_9 : i32 to vector<1x128xi32>
    %65 = arith.cmpi sge, %3, %64 : vector<1x128xi32>
    %c34_i32 = arith.constant 34 : i32
    %66 = vector.broadcast %c34_i32 : i32 to vector<1x128xi32>
    %67 = arith.cmpi slt, %3, %66 : vector<1x128xi32>
    %68 = arith.andi %65, %67 : vector<1x128xi1>
    %69 = arith.ori %63, %68 : vector<1x128xi1>
    %70 = arith.extui %69 : vector<1x128xi1> to vector<1x128xi32>
    %71 = arith.sitofp %70 : vector<1x128xi32> to vector<1x128xf32>
    %c16_i32_10 = arith.constant 16 : i32
    %72 = vector.broadcast %c16_i32_10 : i32 to vector<1x128xi32>
    %73 = arith.cmpi slt, %3, %72 : vector<1x128xi32>
    %74 = arith.extui %73 : vector<1x128xi1> to vector<1x128xi32>
    %75 = arith.sitofp %74 : vector<1x128xi32> to vector<1x128xf32>
    %c15_i32_11 = arith.constant 15 : i32
    %76 = tpu.dynamic_rotate %1 by %c15_i32_11 dim 0 : vector<16x128xf32>, i32 -> vector<16x128xf32>
    %77 = vector.broadcast %32 : vector<16x1xf32> to vector<16x128xf32>
    %78 = arith.mulf %76, %77 : vector<16x128xf32>
    %c1_i32_12 = arith.constant 1 : i32
    %79 = tpu.dynamic_rotate %1 by %c1_i32_12 dim 0 : vector<16x128xf32>, i32 -> vector<16x128xf32>
    %80 = vector.broadcast %30 : vector<16x1xf32> to vector<16x128xf32>
    %81 = arith.mulf %79, %80 : vector<16x128xf32>
    %c14_i32_13 = arith.constant 14 : i32
    %82 = tpu.dynamic_rotate %1 by %c14_i32_13 dim 0 : vector<16x128xf32>, i32 -> vector<16x128xf32>
    %83 = vector.broadcast %34 : vector<16x1xf32> to vector<16x128xf32>
    %84 = arith.mulf %82, %83 : vector<16x128xf32>
    %c2_i32_14 = arith.constant 2 : i32
    %85 = tpu.dynamic_rotate %1 by %c2_i32_14 dim 0 : vector<16x128xf32>, i32 -> vector<16x128xf32>
    %86 = vector.broadcast %28 : vector<16x1xf32> to vector<16x128xf32>
    %87 = arith.mulf %85, %86 : vector<16x128xf32>
    %cst = arith.constant 0.402619958 : f32
    %88 = vector.broadcast %cst : f32 to vector<16x128xf32>
    %89 = arith.mulf %88, %1 : vector<16x128xf32>
    %90 = arith.addf %78, %81 : vector<16x128xf32>
    %cst_15 = arith.constant 0.244201347 : f32
    %91 = vector.broadcast %cst_15 : f32 to vector<16x128xf32>
    %92 = arith.mulf %91, %90 : vector<16x128xf32>
    %93 = arith.addf %89, %92 : vector<16x128xf32>
    %94 = arith.addf %84, %87 : vector<16x128xf32>
    %cst_16 = arith.constant 0.054488685 : f32
    %95 = vector.broadcast %cst_16 : f32 to vector<16x128xf32>
    %96 = arith.mulf %95, %94 : vector<16x128xf32>
    %97 = arith.addf %93, %96 : vector<16x128xf32>
    %cst_17 = arith.constant 0.244201347 : f32
    %98 = vector.broadcast %cst_17 : f32 to vector<16x128xf32>
    %99 = arith.mulf %98, %78 : vector<16x128xf32>
    %cst_18 = arith.constant 0.054488685 : f32
    %100 = vector.broadcast %cst_18 : f32 to vector<16x128xf32>
    %101 = arith.mulf %100, %84 : vector<16x128xf32>
    %102 = arith.addf %99, %101 : vector<16x128xf32>
    %103 = vector.broadcast %7 : vector<16x1xf32> to vector<16x128xf32>
    %104 = arith.mulf %103, %102 : vector<16x128xf32>
    %105 = arith.addf %97, %104 : vector<16x128xf32>
    %cst_19 = arith.constant 0.244201347 : f32
    %106 = vector.broadcast %cst_19 : f32 to vector<16x128xf32>
    %107 = arith.mulf %106, %81 : vector<16x128xf32>
    %cst_20 = arith.constant 0.054488685 : f32
    %108 = vector.broadcast %cst_20 : f32 to vector<16x128xf32>
    %109 = arith.mulf %108, %87 : vector<16x128xf32>
    %110 = arith.addf %107, %109 : vector<16x128xf32>
    %111 = vector.broadcast %11 : vector<16x1xf32> to vector<16x128xf32>
    %112 = arith.mulf %111, %110 : vector<16x128xf32>
    %113 = arith.addf %105, %112 : vector<16x128xf32>
    %cst_21 = arith.constant 0.054488685 : f32
    %114 = vector.broadcast %cst_21 : f32 to vector<16x128xf32>
    %115 = arith.mulf %114, %1 : vector<16x128xf32>
    %116 = vector.broadcast %18 : vector<16x1xf32> to vector<16x128xf32>
    %117 = arith.mulf %116, %115 : vector<16x128xf32>
    %118 = arith.addf %113, %117 : vector<16x128xf32>
    %c127_i32 = arith.constant 127 : i32
    %119 = tpu.dynamic_rotate %118 by %c127_i32 dim 1 : vector<16x128xf32>, i32 -> vector<16x128xf32>
    %c1_i32_22 = arith.constant 1 : i32
    %120 = tpu.dynamic_rotate %118 by %c1_i32_22 dim 1 : vector<16x128xf32>, i32 -> vector<16x128xf32>
    %c126_i32 = arith.constant 126 : i32
    %121 = tpu.dynamic_rotate %118 by %c126_i32 dim 1 : vector<16x128xf32>, i32 -> vector<16x128xf32>
    %c2_i32_23 = arith.constant 2 : i32
    %122 = tpu.dynamic_rotate %118 by %c2_i32_23 dim 1 : vector<16x128xf32>, i32 -> vector<16x128xf32>
    %cst_24 = arith.constant 0.402619958 : f32
    %123 = vector.broadcast %cst_24 : f32 to vector<16x128xf32>
    %124 = arith.mulf %123, %118 : vector<16x128xf32>
    %125 = arith.addf %119, %120 : vector<16x128xf32>
    %cst_25 = arith.constant 0.244201347 : f32
    %126 = vector.broadcast %cst_25 : f32 to vector<16x128xf32>
    %127 = arith.mulf %126, %125 : vector<16x128xf32>
    %128 = arith.addf %124, %127 : vector<16x128xf32>
    %129 = arith.addf %121, %122 : vector<16x128xf32>
    %cst_26 = arith.constant 0.054488685 : f32
    %130 = vector.broadcast %cst_26 : f32 to vector<16x128xf32>
    %131 = arith.mulf %130, %129 : vector<16x128xf32>
    %132 = arith.addf %128, %131 : vector<16x128xf32>
    %cst_27 = arith.constant 0.244201347 : f32
    %133 = vector.broadcast %cst_27 : f32 to vector<16x128xf32>
    %134 = arith.mulf %133, %119 : vector<16x128xf32>
    %cst_28 = arith.constant 0.054488685 : f32
    %135 = vector.broadcast %cst_28 : f32 to vector<16x128xf32>
    %136 = arith.mulf %135, %121 : vector<16x128xf32>
    %137 = arith.addf %134, %136 : vector<16x128xf32>
    %138 = vector.broadcast %41 : vector<1x128xf32> to vector<16x128xf32>
    %139 = arith.mulf %138, %137 : vector<16x128xf32>
    %140 = arith.addf %132, %139 : vector<16x128xf32>
    %cst_29 = arith.constant 0.244201347 : f32
    %141 = vector.broadcast %cst_29 : f32 to vector<16x128xf32>
    %142 = arith.mulf %141, %120 : vector<16x128xf32>
    %cst_30 = arith.constant 0.054488685 : f32
    %143 = vector.broadcast %cst_30 : f32 to vector<16x128xf32>
    %144 = arith.mulf %143, %122 : vector<16x128xf32>
    %145 = arith.addf %142, %144 : vector<16x128xf32>
    %146 = vector.broadcast %48 : vector<1x128xf32> to vector<16x128xf32>
    %147 = arith.mulf %146, %145 : vector<16x128xf32>
    %148 = arith.addf %140, %147 : vector<16x128xf32>
    %cst_31 = arith.constant 0.054488685 : f32
    %149 = vector.broadcast %cst_31 : f32 to vector<16x128xf32>
    %150 = arith.mulf %149, %118 : vector<16x128xf32>
    %151 = vector.broadcast %61 : vector<1x128xf32> to vector<16x128xf32>
    %152 = arith.mulf %151, %150 : vector<16x128xf32>
    %153 = arith.addf %148, %152 : vector<16x128xf32>
    %154 = vector.broadcast %71 : vector<1x128xf32> to vector<16x128xf32>
    %155 = arith.mulf %153, %154 : vector<16x128xf32>
    %cst_32 = arith.constant 2.000000e+00 : f32
    %156 = vector.broadcast %cst_32 : f32 to vector<16x128xf32>
    %157 = arith.mulf %156, %155 : vector<16x128xf32>
    %c15_i32_33 = arith.constant 15 : i32
    %158 = tpu.dynamic_rotate %155 by %c15_i32_33 dim 0 : vector<16x128xf32>, i32 -> vector<16x128xf32>
    %159 = vector.broadcast %32 : vector<16x1xf32> to vector<16x128xf32>
    %160 = arith.mulf %158, %159 : vector<16x128xf32>
    %161 = arith.addf %157, %160 : vector<16x128xf32>
    %c1_i32_34 = arith.constant 1 : i32
    %162 = tpu.dynamic_rotate %155 by %c1_i32_34 dim 0 : vector<16x128xf32>, i32 -> vector<16x128xf32>
    %163 = vector.broadcast %30 : vector<16x1xf32> to vector<16x128xf32>
    %164 = arith.mulf %162, %163 : vector<16x128xf32>
    %165 = arith.addf %161, %164 : vector<16x128xf32>
    %166 = arith.addf %7, %11 : vector<16x1xf32>
    %167 = vector.broadcast %166 : vector<16x1xf32> to vector<16x128xf32>
    %168 = arith.mulf %167, %155 : vector<16x128xf32>
    %169 = arith.addf %165, %168 : vector<16x128xf32>
    %c127_i32_35 = arith.constant 127 : i32
    %170 = tpu.dynamic_rotate %169 by %c127_i32_35 dim 1 : vector<16x128xf32>, i32 -> vector<16x128xf32>
    %c1_i32_36 = arith.constant 1 : i32
    %171 = tpu.dynamic_rotate %169 by %c1_i32_36 dim 1 : vector<16x128xf32>, i32 -> vector<16x128xf32>
    %172 = arith.subf %170, %171 : vector<16x128xf32>
    %173 = arith.subf %48, %41 : vector<1x128xf32>
    %174 = vector.broadcast %173 : vector<1x128xf32> to vector<16x128xf32>
    %175 = arith.mulf %174, %169 : vector<16x128xf32>
    %176 = arith.addf %172, %175 : vector<16x128xf32>
    %c15_i32_37 = arith.constant 15 : i32
    %177 = tpu.dynamic_rotate %155 by %c15_i32_37 dim 0 : vector<16x128xf32>, i32 -> vector<16x128xf32>
    %178 = vector.broadcast %32 : vector<16x1xf32> to vector<16x128xf32>
    %179 = arith.mulf %177, %178 : vector<16x128xf32>
    %c1_i32_38 = arith.constant 1 : i32
    %180 = tpu.dynamic_rotate %155 by %c1_i32_38 dim 0 : vector<16x128xf32>, i32 -> vector<16x128xf32>
    %181 = vector.broadcast %30 : vector<16x1xf32> to vector<16x128xf32>
    %182 = arith.mulf %180, %181 : vector<16x128xf32>
    %183 = arith.subf %179, %182 : vector<16x128xf32>
    %184 = arith.subf %11, %7 : vector<16x1xf32>
    %185 = vector.broadcast %184 : vector<16x1xf32> to vector<16x128xf32>
    %186 = arith.mulf %185, %155 : vector<16x128xf32>
    %187 = arith.addf %183, %186 : vector<16x128xf32>
    %cst_39 = arith.constant 2.000000e+00 : f32
    %188 = vector.broadcast %cst_39 : f32 to vector<16x128xf32>
    %189 = arith.mulf %188, %187 : vector<16x128xf32>
    %c127_i32_40 = arith.constant 127 : i32
    %190 = tpu.dynamic_rotate %187 by %c127_i32_40 dim 1 : vector<16x128xf32>, i32 -> vector<16x128xf32>
    %191 = arith.addf %189, %190 : vector<16x128xf32>
    %c1_i32_41 = arith.constant 1 : i32
    %192 = tpu.dynamic_rotate %187 by %c1_i32_41 dim 1 : vector<16x128xf32>, i32 -> vector<16x128xf32>
    %193 = arith.addf %191, %192 : vector<16x128xf32>
    %194 = arith.addf %41, %48 : vector<1x128xf32>
    %195 = vector.broadcast %194 : vector<1x128xf32> to vector<16x128xf32>
    %196 = arith.mulf %195, %187 : vector<16x128xf32>
    %197 = arith.addf %193, %196 : vector<16x128xf32>
    %198 = arith.mulf %176, %176 : vector<16x128xf32>
    %199 = arith.mulf %197, %197 : vector<16x128xf32>
    %200 = arith.addf %198, %199 : vector<16x128xf32>
    %cst_42 = arith.constant 9.99999997E-7 : f32
    %201 = vector.broadcast %cst_42 : f32 to vector<16x128xf32>
    %202 = arith.addf %200, %201 : vector<16x128xf32>
    %203 = math.sqrt %202 : vector<16x128xf32>
    %204 = vector.broadcast %71 : vector<1x128xf32> to vector<16x128xf32>
    %205 = arith.mulf %203, %204 : vector<16x128xf32>
    %c1_i32_43 = arith.constant 1 : i32
    %206 = tpu.dynamic_rotate %205 by %c1_i32_43 dim 0 : vector<16x128xf32>, i32 -> vector<16x128xf32>
    %207 = vector.broadcast %30 : vector<16x1xf32> to vector<16x128xf32>
    %208 = arith.mulf %206, %207 : vector<16x128xf32>
    %c15_i32_44 = arith.constant 15 : i32
    %209 = tpu.dynamic_rotate %205 by %c15_i32_44 dim 0 : vector<16x128xf32>, i32 -> vector<16x128xf32>
    %210 = vector.broadcast %32 : vector<16x1xf32> to vector<16x128xf32>
    %211 = arith.mulf %209, %210 : vector<16x128xf32>
    %c127_i32_45 = arith.constant 127 : i32
    %212 = tpu.dynamic_rotate %205 by %c127_i32_45 dim 1 : vector<16x128xf32>, i32 -> vector<16x128xf32>
    %c1_i32_46 = arith.constant 1 : i32
    %213 = tpu.dynamic_rotate %205 by %c1_i32_46 dim 1 : vector<16x128xf32>, i32 -> vector<16x128xf32>
    %214 = arith.maximumf %212, %213 : vector<16x128xf32>
    %215 = arith.maximumf %211, %208 : vector<16x128xf32>
    %c127_i32_47 = arith.constant 127 : i32
    %216 = tpu.dynamic_rotate %211 by %c127_i32_47 dim 1 : vector<16x128xf32>, i32 -> vector<16x128xf32>
    %c1_i32_48 = arith.constant 1 : i32
    %217 = tpu.dynamic_rotate %208 by %c1_i32_48 dim 1 : vector<16x128xf32>, i32 -> vector<16x128xf32>
    %218 = arith.maximumf %216, %217 : vector<16x128xf32>
    %c1_i32_49 = arith.constant 1 : i32
    %219 = tpu.dynamic_rotate %211 by %c1_i32_49 dim 1 : vector<16x128xf32>, i32 -> vector<16x128xf32>
    %c127_i32_50 = arith.constant 127 : i32
    %220 = tpu.dynamic_rotate %208 by %c127_i32_50 dim 1 : vector<16x128xf32>, i32 -> vector<16x128xf32>
    %221 = arith.maximumf %219, %220 : vector<16x128xf32>
    %222 = math.absf %176 : vector<16x128xf32>
    %223 = math.absf %197 : vector<16x128xf32>
    %cst_51 = arith.constant 0.414213568 : f32
    %224 = vector.broadcast %cst_51 : f32 to vector<16x128xf32>
    %225 = arith.mulf %224, %222 : vector<16x128xf32>
    %226 = arith.cmpf ole, %223, %225 : vector<16x128xf32>
    %cst_52 = arith.constant 2.41421366 : f32
    %227 = vector.broadcast %cst_52 : f32 to vector<16x128xf32>
    %228 = arith.mulf %227, %222 : vector<16x128xf32>
    %229 = arith.cmpf oge, %223, %228 : vector<16x128xf32>
    %cst_53 = arith.constant 0.000000e+00 : f32
    %230 = vector.broadcast %cst_53 : f32 to vector<16x128xf32>
    %231 = arith.cmpf ogt, %197, %230 : vector<16x128xf32>
    %cst_54 = arith.constant 0.000000e+00 : f32
    %232 = vector.broadcast %cst_54 : f32 to vector<16x128xf32>
    %233 = arith.cmpf ogt, %176, %232 : vector<16x128xf32>
    %234 = arith.xori %231, %233 : vector<16x128xi1>
    %cst_55 = arith.constant dense<true> : vector<16x128xi1>
    %235 = arith.xori %234, %cst_55 : vector<16x128xi1>
    %236 = arith.select %235, %218, %221 : vector<16x128xi1>, vector<16x128xf32>
    %237 = arith.select %229, %215, %236 : vector<16x128xi1>, vector<16x128xf32>
    %238 = arith.select %226, %214, %237 : vector<16x128xi1>, vector<16x128xf32>
    %239 = arith.cmpf ogt, %205, %238 : vector<16x128xf32>
    %240 = arith.extui %239 : vector<16x128xi1> to vector<16x128xi32>
    %241 = arith.sitofp %240 : vector<16x128xi32> to vector<16x128xf32>
    %242 = arith.mulf %205, %241 : vector<16x128xf32>
    %cst_56 = arith.constant 2.000000e-01 : f32
    %243 = vector.broadcast %cst_56 : f32 to vector<16x128xf32>
    %244 = arith.cmpf ogt, %242, %243 : vector<16x128xf32>
    %245 = arith.extui %244 : vector<16x128xi1> to vector<16x128xi32>
    %246 = arith.sitofp %245 : vector<16x128xi32> to vector<16x128xf32>
    %cst_57 = arith.constant 1.000000e-01 : f32
    %247 = vector.broadcast %cst_57 : f32 to vector<16x128xf32>
    %248 = arith.cmpf ogt, %242, %247 : vector<16x128xf32>
    %249 = arith.extui %248 : vector<16x128xi1> to vector<16x128xi32>
    %250 = arith.sitofp %249 : vector<16x128xi32> to vector<16x128xf32>
    %251 = arith.subf %250, %246 : vector<16x128xf32>
    %252 = vector.shape_cast %246 : vector<16x128xf32> to vector<1x16x128xf32>
    %cst_58 = arith.constant dense<0.000000e+00> : vector<1xf32>
    %253 = vector.multi_reduction <add>, %252, %cst_58 [1, 2] : vector<1x16x128xf32> to vector<1xf32>
    %254 = vector.shape_cast %253 : vector<1xf32> to vector<1x1x1xf32>
    %255 = vector.extract %254[0, 0, 0] : f32 from vector<1x1x1xf32>
    %cst_59 = arith.constant -1.000000e+00 : f32
    %256:3 = scf.while (%arg3 = %246, %arg4 = %cst_59, %arg5 = %255) : (vector<16x128xf32>, f32, f32) -> (vector<16x128xf32>, f32, f32) {
      %268 = arith.cmpf ogt, %arg5, %arg4 : f32
      scf.condition(%268) %arg3, %arg4, %arg5 : vector<16x128xf32>, f32, f32
    } do {
    ^bb0(%arg3: vector<16x128xf32>, %arg4: f32, %arg5: f32):
      %c1_i32_64 = arith.constant 1 : i32
      %268 = tpu.dynamic_rotate %arg3 by %c1_i32_64 dim 0 : vector<16x128xf32>, i32 -> vector<16x128xf32>
      %269 = vector.broadcast %30 : vector<16x1xf32> to vector<16x128xf32>
      %270 = arith.mulf %268, %269 : vector<16x128xf32>
      %271 = arith.addf %arg3, %270 : vector<16x128xf32>
      %c15_i32_65 = arith.constant 15 : i32
      %272 = tpu.dynamic_rotate %arg3 by %c15_i32_65 dim 0 : vector<16x128xf32>, i32 -> vector<16x128xf32>
      %273 = vector.broadcast %32 : vector<16x1xf32> to vector<16x128xf32>
      %274 = arith.mulf %272, %273 : vector<16x128xf32>
      %275 = arith.addf %271, %274 : vector<16x128xf32>
      %c1_i32_66 = arith.constant 1 : i32
      %276 = tpu.dynamic_rotate %275 by %c1_i32_66 dim 1 : vector<16x128xf32>, i32 -> vector<16x128xf32>
      %277 = arith.addf %275, %276 : vector<16x128xf32>
      %c127_i32_67 = arith.constant 127 : i32
      %278 = tpu.dynamic_rotate %275 by %c127_i32_67 dim 1 : vector<16x128xf32>, i32 -> vector<16x128xf32>
      %279 = arith.addf %277, %278 : vector<16x128xf32>
      %280 = arith.subf %279, %arg3 : vector<16x128xf32>
      %cst_68 = arith.constant 5.000000e-01 : f32
      %281 = vector.broadcast %cst_68 : f32 to vector<16x128xf32>
      %282 = arith.cmpf ogt, %280, %281 : vector<16x128xf32>
      %283 = arith.extui %282 : vector<16x128xi1> to vector<16x128xi32>
      %284 = arith.sitofp %283 : vector<16x128xi32> to vector<16x128xf32>
      %285 = arith.mulf %251, %284 : vector<16x128xf32>
      %286 = arith.maximumf %arg3, %285 : vector<16x128xf32>
      %c1_i32_69 = arith.constant 1 : i32
      %287 = tpu.dynamic_rotate %286 by %c1_i32_69 dim 0 : vector<16x128xf32>, i32 -> vector<16x128xf32>
      %288 = vector.broadcast %30 : vector<16x1xf32> to vector<16x128xf32>
      %289 = arith.mulf %287, %288 : vector<16x128xf32>
      %290 = arith.addf %286, %289 : vector<16x128xf32>
      %c15_i32_70 = arith.constant 15 : i32
      %291 = tpu.dynamic_rotate %286 by %c15_i32_70 dim 0 : vector<16x128xf32>, i32 -> vector<16x128xf32>
      %292 = vector.broadcast %32 : vector<16x1xf32> to vector<16x128xf32>
      %293 = arith.mulf %291, %292 : vector<16x128xf32>
      %294 = arith.addf %290, %293 : vector<16x128xf32>
      %c1_i32_71 = arith.constant 1 : i32
      %295 = tpu.dynamic_rotate %294 by %c1_i32_71 dim 1 : vector<16x128xf32>, i32 -> vector<16x128xf32>
      %296 = arith.addf %294, %295 : vector<16x128xf32>
      %c127_i32_72 = arith.constant 127 : i32
      %297 = tpu.dynamic_rotate %294 by %c127_i32_72 dim 1 : vector<16x128xf32>, i32 -> vector<16x128xf32>
      %298 = arith.addf %296, %297 : vector<16x128xf32>
      %299 = arith.subf %298, %286 : vector<16x128xf32>
      %cst_73 = arith.constant 5.000000e-01 : f32
      %300 = vector.broadcast %cst_73 : f32 to vector<16x128xf32>
      %301 = arith.cmpf ogt, %299, %300 : vector<16x128xf32>
      %302 = arith.extui %301 : vector<16x128xi1> to vector<16x128xi32>
      %303 = arith.sitofp %302 : vector<16x128xi32> to vector<16x128xf32>
      %304 = arith.mulf %251, %303 : vector<16x128xf32>
      %305 = arith.maximumf %286, %304 : vector<16x128xf32>
      %c1_i32_74 = arith.constant 1 : i32
      %306 = tpu.dynamic_rotate %305 by %c1_i32_74 dim 0 : vector<16x128xf32>, i32 -> vector<16x128xf32>
      %307 = vector.broadcast %30 : vector<16x1xf32> to vector<16x128xf32>
      %308 = arith.mulf %306, %307 : vector<16x128xf32>
      %309 = arith.addf %305, %308 : vector<16x128xf32>
      %c15_i32_75 = arith.constant 15 : i32
      %310 = tpu.dynamic_rotate %305 by %c15_i32_75 dim 0 : vector<16x128xf32>, i32 -> vector<16x128xf32>
      %311 = vector.broadcast %32 : vector<16x1xf32> to vector<16x128xf32>
      %312 = arith.mulf %310, %311 : vector<16x128xf32>
      %313 = arith.addf %309, %312 : vector<16x128xf32>
      %c1_i32_76 = arith.constant 1 : i32
      %314 = tpu.dynamic_rotate %313 by %c1_i32_76 dim 1 : vector<16x128xf32>, i32 -> vector<16x128xf32>
      %315 = arith.addf %313, %314 : vector<16x128xf32>
      %c127_i32_77 = arith.constant 127 : i32
      %316 = tpu.dynamic_rotate %313 by %c127_i32_77 dim 1 : vector<16x128xf32>, i32 -> vector<16x128xf32>
      %317 = arith.addf %315, %316 : vector<16x128xf32>
      %318 = arith.subf %317, %305 : vector<16x128xf32>
      %cst_78 = arith.constant 5.000000e-01 : f32
      %319 = vector.broadcast %cst_78 : f32 to vector<16x128xf32>
      %320 = arith.cmpf ogt, %318, %319 : vector<16x128xf32>
      %321 = arith.extui %320 : vector<16x128xi1> to vector<16x128xi32>
      %322 = arith.sitofp %321 : vector<16x128xi32> to vector<16x128xf32>
      %323 = arith.mulf %251, %322 : vector<16x128xf32>
      %324 = arith.maximumf %305, %323 : vector<16x128xf32>
      %c1_i32_79 = arith.constant 1 : i32
      %325 = tpu.dynamic_rotate %324 by %c1_i32_79 dim 0 : vector<16x128xf32>, i32 -> vector<16x128xf32>
      %326 = vector.broadcast %30 : vector<16x1xf32> to vector<16x128xf32>
      %327 = arith.mulf %325, %326 : vector<16x128xf32>
      %328 = arith.addf %324, %327 : vector<16x128xf32>
      %c15_i32_80 = arith.constant 15 : i32
      %329 = tpu.dynamic_rotate %324 by %c15_i32_80 dim 0 : vector<16x128xf32>, i32 -> vector<16x128xf32>
      %330 = vector.broadcast %32 : vector<16x1xf32> to vector<16x128xf32>
      %331 = arith.mulf %329, %330 : vector<16x128xf32>
      %332 = arith.addf %328, %331 : vector<16x128xf32>
      %c1_i32_81 = arith.constant 1 : i32
      %333 = tpu.dynamic_rotate %332 by %c1_i32_81 dim 1 : vector<16x128xf32>, i32 -> vector<16x128xf32>
      %334 = arith.addf %332, %333 : vector<16x128xf32>
      %c127_i32_82 = arith.constant 127 : i32
      %335 = tpu.dynamic_rotate %332 by %c127_i32_82 dim 1 : vector<16x128xf32>, i32 -> vector<16x128xf32>
      %336 = arith.addf %334, %335 : vector<16x128xf32>
      %337 = arith.subf %336, %324 : vector<16x128xf32>
      %cst_83 = arith.constant 5.000000e-01 : f32
      %338 = vector.broadcast %cst_83 : f32 to vector<16x128xf32>
      %339 = arith.cmpf ogt, %337, %338 : vector<16x128xf32>
      %340 = arith.extui %339 : vector<16x128xi1> to vector<16x128xi32>
      %341 = arith.sitofp %340 : vector<16x128xi32> to vector<16x128xf32>
      %342 = arith.mulf %251, %341 : vector<16x128xf32>
      %343 = arith.maximumf %324, %342 : vector<16x128xf32>
      %344 = vector.shape_cast %343 : vector<16x128xf32> to vector<1x16x128xf32>
      %cst_84 = arith.constant dense<0.000000e+00> : vector<1xf32>
      %345 = vector.multi_reduction <add>, %344, %cst_84 [1, 2] : vector<1x16x128xf32> to vector<1xf32>
      %346 = vector.shape_cast %345 : vector<1xf32> to vector<1x1x1xf32>
      %347 = vector.extract %346[0, 0, 0] : f32 from vector<1x1x1xf32>
      scf.yield %343, %arg5, %347 : vector<16x128xf32>, f32, f32
    }
    %c110_i32 = arith.constant 110 : i32
    %257 = tpu.dynamic_rotate %256#0 by %c110_i32 dim 1 : vector<16x128xf32>, i32 -> vector<16x128xf32>
    %258 = arith.subf %256#0, %257 : vector<16x128xf32>
    %259 = vector.broadcast %75 : vector<1x128xf32> to vector<16x128xf32>
    %260 = arith.mulf %258, %259 : vector<16x128xf32>
    %261 = arith.mulf %260, %260 : vector<16x128xf32>
    %262 = vector.shape_cast %261 : vector<16x128xf32> to vector<1x16x128xf32>
    %cst_60 = arith.constant dense<0.000000e+00> : vector<1xf32>
    %263 = vector.multi_reduction <add>, %262, %cst_60 [1, 2] : vector<1x16x128xf32> to vector<1xf32>
    %264 = vector.shape_cast %263 : vector<1xf32> to vector<1x1x1xf32>
    %265 = vector.extract %264[0, 0, 0] : f32 from vector<1x1x1xf32>
    %266 = vector.broadcast %265 : f32 to vector<1x1x1xf32>
    %c0_61 = arith.constant 0 : index
    %c0_62 = arith.constant 0 : index
    %c0_63 = arith.constant 0 : index
    %267 = vector.load %arg2[%c0_61, %c0_62, %c0_63] : memref<1x1x1xf32, #tpu.memory_space<vmem>>, vector<1x1x1xf32>
    tpu.vector_store %arg2[%c0_61, %c0_62, %c0_63], %266 {strides = array<i32>} : memref<1x1x1xf32, #tpu.memory_space<vmem>>, vector<1x1x1xf32>,
    return
  }
  func.func @transform_0(%arg0: i32) -> (i32, i32, i32) {
    %c0_i32 = arith.constant 0 : i32
    %c0_i32_0 = arith.constant 0 : i32
    %c0_i32_1 = arith.constant 0 : i32
    return %arg0, %c0_i32, %c0_i32_0 : i32, i32, i32
  }
  func.func @transform_1(%arg0: i32) -> (i32, i32, i32) {
    %c0_i32 = arith.constant 0 : i32
    %c0_i32_0 = arith.constant 0 : i32
    %c0_i32_1 = arith.constant 0 : i32
    return %arg0, %c0_i32, %c0_i32_0 : i32, i32, i32
  }
}

</mosaic_0001>

<bundles_post_ra>
// kernel: canny_loss.1
= control target key start
LH: loop header
LB: loop body
LE: loop exit
PB: predicated region body
PF: predicated region fallthrough
CT: control target
= control target key end

     0   :  { %s947_s6 = smov 0   ;;  %s1269_s0 = inlined_call_operand.vmem [shape: f32[2,16,128], index: 0, kind: input, shape index: {}]   ;;  %s1270_s1 = inlined_call_operand.vmem [shape: f32[2,1,1], index: 1, kind: output, shape index: {}]  }
   0x1 LB: > { %s774_s7 = sadd.s32 4294967295, %s905_s6   ;;  %p778_p0 = scmp.ge.s32.totalorder %s905_s6, 1  ;;  %s905_s6 = sphi %s947_s6, %s11_s6  }
   0x2   : > { %p87_p1 = scmp.lt.s32.totalorder %s905_s6, 3 }
   0x4   : > { %p88_p2 = pnand %p778_p0, %p87_p1 }
   0x5   : > { %p105_p3 = scmp.lt.s32.totalorder (!%p88_p2), %s774_s7, 1  ;;  %v115_v0 = vlaneseq (!%p88_p2)  ;;  %v927_v2 = vmov (!%p88_p2), 0.0   ;;  %s928_s15 = smov (!%p88_p2), 1  }
   0x6   : > { %91 = sbr.rel (%p88_p2) target bundleno = 1803 (0x70b), region = 24  ;;  %s929_s16 = smov (!%p88_p2), 127  }
   0x7   : > { %v958_v1 = vshrl.u32 (!%p88_p2), %v115_v0, 7  ;;  %s930_s17 = smov (!%p88_p2), 126   ;;  %s931_s18 = smov (!%p88_p2), 2  }
   0x9   : > { %vm142_vm0 = vcmp.ge.s32.totalorder (!%p88_p2), %v958_v1, 2  ;;  %vm144_vm1 = vcmp.ge.s32.totalorder (!%p88_p2), %v958_v1, 1  ;;  %vm196_vm2 = vcmp.lt.s32.totalorder (!%p88_p2), %v958_v1, 7  ;;  %vm203_vm3 = vcmp.lt.s32.totalorder (!%p88_p2), %v958_v1, 1 }
   0xa   : > { %v785_v3 = vsel (!%p88_p2), %vm142_vm0, 1.0, %v927_v2  ;;  %v972_v4 = vsel (!%p88_p2), %vm144_vm1, 1.0, %v927_v2  ;;  %vm210_vm4 = vcmp.lt.s32.totalorder (!%p88_p2), %v958_v1, 6  ;;  %vm217_vm5 = vcmp.lt.s32.totalorder (!%p88_p2), %v958_v1, 2 }
   0xb   : > { %vm120_vm6 = vcmp.eq.s32.totalorder (!%p88_p2), %v958_v1, 0  ;;  %vm132_vm7 = vcmp.eq.s32.totalorder (!%p88_p2), %v958_v1, 1  ;;  %v117_v23 = vadd.s32 (!%p88_p2), 8, %v958_v1 }
   0xc   : > { %v997_v24 = vsel (!%p88_p2), %vm120_vm6, 1.0, %v927_v2  ;;  %v783_v28 = vsel (!%p88_p2), %vm132_vm7, 1.0, %v927_v2 }
   0xd   : > { %s1291_s7 = smov (!%p105_p3, %s774_s7), 1  ;;  %vm147_vm8 = vcmp.lt.s32.totalorder %v117_v23, 15  ;;  %vm149_vm9 = vcmp.lt.s32.totalorder %v117_v23, 14  ;;  %vm127_vm10 = vcmp.eq.s32.totalorder %v117_v23, 15  ;;  %vm135_vm11 = vcmp.eq.s32.totalorder %v117_v23, 14 }
   0xe   : > { %s810_s8 = sshll.u32 %s1291_s7, 4  ;;  %s112_s11 = scalar_lea.vmem %s1270_s1, %s1291_s7  ;;  %v1006_v40 = vsel %vm147_vm8, 1.0, %v927_v2  ;;  %v788_v42 = vsel %vm149_vm9, 1.0, %v927_v2  ;;  %v1017_v60 = vsel %vm127_vm10, 1.0, %v927_v2 }
   0xf   : > { %s109_s14 = scalar_lea.vmem %s1269_s0, %s810_s8 }
  0x10   : > { %v113_v5 = vld [vmem:[%s109_s14] sm:$0xff]  ;;  %v974_v6 = vld [vmem:[%s109_s14 + $0x8] sm:$0xff] }
  0x11   : > { %v194_v7 = vrot.slane %v113_v5, 1  ;;  %v195_v8 = vrot.slane %v974_v6, 1  ;;  %v201_v9 = vrot.slane %v113_v5, 7  ;;  %v202_v10 = vrot.slane %v974_v6, 7 }
  0x12   : > { %v208_v11 = vrot.slane %v113_v5, 2  ;;  %v209_v12 = vrot.slane %v974_v6, 2  ;;  %v215_v13 = vrot.slane %v113_v5, 6  ;;  %v216_v14 = vrot.slane %v974_v6, 6 }
  0x13   : > { %v197_v15 = vsel %vm196_vm2, %v194_v7, %v195_v8  ;;  %v205_v16 = vsel %vm203_vm3, %v202_v10, %v201_v9  ;;  %v222_v25 = vmul.f32 0.40261996, %v113_v5  ;;  %v256_v33 = vmul.f32 0.054488685, %v113_v5 }
  0x14   : > { %v206_v17 = vmul.f32 %v972_v4, %v205_v16  ;;  %v211_v18 = vsel %vm210_vm4, %v208_v11, %v209_v12  ;;  %v219_v19 = vsel %vm217_vm5, %v216_v14, %v215_v13  ;;  %v236_v20 = vmul.f32 0.24420135, %v197_v15 }
  0x15   : > { %v220_v21 = vmul.f32 %v785_v3, %v219_v19  ;;  %v238_v22 = vmul.f32 0.054488685, %v211_v18  ;;  %v198_v34 = vsel %vm196_vm2, %v195_v8, %v194_v7  ;;  %v204_v38 = vsel %vm203_vm3, %v201_v9, %v202_v10 }
  0x16   : > { %v224_v26 = vadd.f32 %v206_v17, %v197_v15  ;;  %v246_v27 = vmul.f32 0.24420135, %v206_v17  ;;  %v212_v41 = vsel %vm210_vm4, %v209_v12, %v208_v11  ;;  %v200_v43 = vmul.f32 %v1006_v40, %v198_v34 }
  0x17   : > { %v230_v29 = vadd.f32 %v220_v21, %v211_v18  ;;  %v240_v30 = vadd.f32 %v238_v22, %v236_v20  ;;  %v248_v31 = vmul.f32 0.054488685, %v220_v21  ;;  %v218_v44 = vsel %vm217_vm5, %v215_v13, %v216_v14 }
  0x18   : > { %v226_v32 = vmul.f32 0.24420135, %v224_v26  ;;  %v214_v47 = vmul.f32 %v788_v42, %v212_v41  ;;  %v247_v48 = vmul.f32 0.24420135, %v204_v38  ;;  %v223_v49 = vmul.f32 0.40261996, %v974_v6 }
  0x19   : > { %v232_v35 = vmul.f32 0.054488685, %v230_v29  ;;  %v242_v36 = vmul.f32 %v997_v24, %v240_v30  ;;  %v250_v37 = vadd.f32 %v248_v31, %v246_v27  ;;  %v225_v50 = vadd.f32 %v204_v38, %v200_v43 }
  0x1a   : > { %v228_v39 = vadd.f32 %v226_v32, %v222_v25  ;;  %v237_v51 = vmul.f32 0.24420135, %v200_v43  ;;  %v249_v52 = vmul.f32 0.054488685, %v218_v44  ;;  %v258_v54 = vmul.f32 %v783_v28, %v256_v33 }
  0x1b   : > { %v252_v46 = vmul.f32 0.0, %v250_v37  ;;  %v231_v55 = vadd.f32 %v218_v44, %v214_v47  ;;  %v239_v56 = vmul.f32 0.054488685, %v214_v47  ;;  %v227_v57 = vmul.f32 0.24420135, %v225_v50 }
  0x1c   : > { %v234_v45 = vadd.f32 %v232_v35, %v228_v39  ;;  %v251_v58 = vadd.f32 %v249_v52, %v247_v48  ;;  %v257_v3 = vmul.f32 0.054488685, %v974_v6  ;;  %v784_v7 = vsel %vm135_vm11, 1.0, %v927_v2 }
  0x1d   : > { %v233_v61 = vmul.f32 0.054488685, %v231_v55  ;;  %v241_v62 = vadd.f32 %v239_v56, %v237_v51  ;;  %v229_v63 = vadd.f32 %v227_v57, %v223_v49  ;;  %v1023_v11 = vand.u32 127, %v115_v0 }
  0x1e   : > { %v244_v53 = vadd.f32 %v242_v36, %v234_v45  ;;  %v253_v10 = vmul.f32 %v1017_v60, %v251_v58  ;;  %v259_v13 = vmul.f32 %v784_v7, %v257_v3 }
  0x1f   : > { %v243_v8 = vmul.f32 0.0, %v241_v62  ;;  %v235_v9 = vadd.f32 %v233_v61, %v229_v63  ;;  %vm176_vm12 = vcmp.eq.s32.totalorder %v1023_v11, 1  ;;  %vm177_vm13 = vcmp.eq.s32.totalorder %v1023_v11, 19 }
  0x20   : > { %v254_v59 = vadd.f32 %v252_v46, %v244_v53  ;;  %vm179_vm14 = vcmp.eq.s32.totalorder %v1023_v11, 14  ;;  %vm181_vm15 = vcmp.eq.s32.totalorder %v1023_v11, 32  ;;  %vm185_vm0 = vcmp.lt.s32.totalorder %v1023_v11, 16  ;;  %vm178_vm1 = vmor %vm176_vm12, %vm177_vm13 }
  0x21   : > { %v245_v12 = vadd.f32 %v243_v8, %v235_v9  ;;  %v1035_v0 = vsel %vm185_vm0, 1.0, %v927_v2  ;;  %vm180_vm4 = vmor %vm178_vm1, %vm179_vm14  ;;  %vm166_vm6 = vcmp.eq.s32.totalorder %v1023_v11, 0  ;;  %vm167_vm7 = vcmp.eq.s32.totalorder %v1023_v11, 18 }
  0x22   : > { %v260_v5 = vadd.f32 %v258_v54, %v254_v59  ;;  %vm182_vm5 = vmor %vm180_vm4, %vm181_vm15  ;;  %vm171_vm9 = vcmp.eq.s32.totalorder %v1023_v11, 15  ;;  %vm172_vm10 = vcmp.eq.s32.totalorder %v1023_v11, 33  ;;  %vm186_vm11 = vcmp.ge.s32.totalorder %v1023_v11, 18 }
  0x23   : > { %v255_v6 = vadd.f32 %v253_v10, %v245_v12  ;;  %v791_v15 = vsel %vm182_vm5, 1.0, %v927_v2  ;;  %vm168_vm8 = vmor %vm166_vm6, %vm167_vm7  ;;  %vm187_vm12 = vcmp.lt.s32.totalorder %v1023_v11, 34 }
  0x24   : > { %266 = vrot.lane.b32.xlu1 %v260_v5, %s928_s15  ;;  %262 = vrot.lane.b32.xlu0 %v260_v5, %s929_s16  ;;  %v312_v18 = vmul.f32 0.054488685, %v260_v5  ;;  %v278_v29 = vmul.f32 0.40261996, %v260_v5  ;;  %v1045_v31 = vsel %vm168_vm8, 1.0, %v927_v2  ;;  %vm173_vm13 = vmor %vm171_vm9, %vm172_vm10 }
  0x25   : > { %v261_v14 = vadd.f32 %v259_v13, %v255_v6  ;;  %v790_v53 = vsel %vm173_vm13, 1.0, %v927_v2  ;;  %vm188_vm14 = vmand %vm186_vm11, %vm187_vm12 }
  0x26   : > { %v314_v19 = vmul.f32 %v791_v15, %v312_v18  ;;  %vm189_vm15 = vmor %vm185_vm0, %vm188_vm14 }
  0x27   : > { %v313_v16 = vmul.f32 0.054488685, %v261_v14  ;;  %v279_v33 = vmul.f32 0.40261996, %v261_v14  ;;  %v1061_v7 = vsel %vm189_vm15, 1.0, %v927_v2 }
  0x28   : > { %268 = vrot.lane.b32.xlu1 %v261_v14, %s928_s15  ;;  %264 = vrot.lane.b32.xlu0 %v261_v14, %s929_s16 }
  0x29   : > { %v1040_v17 = vmul.f32 %v791_v15, %v313_v16  ;;  %v361_v16 = vsub.f32 0.0, %v997_v24 }
  0x2c   : > { %272 = vrot.lane.b32.xlu1 %v261_v14, %s930_s17  ;;  %270 = vrot.lane.b32.xlu0 %v260_v5, %s930_s17 }
  0x30   : > { %276 = vrot.lane.b32.xlu1 %v261_v14, %s931_s18  ;;  %274 = vrot.lane.b32.xlu0 %v260_v5, %s931_s18 }
  0x96   : > { %v267_v20 = vpop.permute.xlu1 %266  ;;  %v263_v21 = vpop.permute.xlu0 %262 }
  0x97   : > { %v280_v26 = vadd.f32 %v267_v20, %v263_v21  ;;  %v292_v37 = vmul.f32 0.24420135, %v263_v21  ;;  %v302_v45 = vmul.f32 0.24420135, %v267_v20 }
  0x99   : > { %v282_v36 = vmul.f32 0.24420135, %v280_v26 }
  0x9a   : > { %v269_v22 = vpop.permute.xlu1 %268  ;;  %v265_v23 = vpop.permute.xlu0 %264 }
  0x9b   : > { %v281_v25 = vadd.f32 %v269_v22, %v265_v23  ;;  %v293_v35 = vmul.f32 0.24420135, %v265_v23  ;;  %v303_v41 = vmul.f32 0.24420135, %v269_v22  ;;  %v284_v52 = vadd.f32 %v282_v36, %v278_v29 }
  0x9d   : > { %v283_v34 = vmul.f32 0.24420135, %v281_v25 }
  0x9e   : > { %v273_v27 = vpop.permute.xlu1 %272  ;;  %v271_v28 = vpop.permute.xlu0 %270 }
  0x9f   : > { %v295_v30 = vmul.f32 0.054488685, %v273_v27  ;;  %v294_v32 = vmul.f32 0.054488685, %v271_v28  ;;  %v285_v49 = vadd.f32 %v283_v34, %v279_v33 }
  0xa1   : > { %v297_v42 = vadd.f32 %v295_v30, %v293_v35  ;;  %v296_v46 = vadd.f32 %v294_v32, %v292_v37 }
  0xa2   : > { %v277_v38 = vpop.permute.xlu1 %276  ;;  %v275_v39 = vpop.permute.xlu0 %274 }
  0xa3   : > { %v287_v43 = vadd.f32 %v277_v38, %v273_v27  ;;  %v305_v44 = vmul.f32 0.054488685, %v277_v38  ;;  %v286_v47 = vadd.f32 %v275_v39, %v271_v28  ;;  %v304_v48 = vmul.f32 0.054488685, %v275_v39 }
  0xa4   : > { %v299_v56 = vmul.f32 %v1045_v31, %v297_v42  ;;  %v298_v58 = vmul.f32 %v1045_v31, %v296_v46  ;;  %v381_v46 = vadd.f32 %v790_v53, %v1045_v31 }
  0xa5   : > { %v289_v50 = vmul.f32 0.054488685, %v287_v43  ;;  %v307_v51 = vadd.f32 %v305_v44, %v303_v41  ;;  %v288_v54 = vmul.f32 0.054488685, %v286_v47  ;;  %v306_v55 = vadd.f32 %v304_v48, %v302_v45 }
  0xa6   : > { %v354_v43 = vsub.f32 %v790_v53, %v1045_v31 }
  0xa7   : > { %v291_v57 = vadd.f32 %v289_v50, %v285_v49  ;;  %v290_v59 = vadd.f32 %v288_v54, %v284_v52  ;;  %v309_v62 = vmul.f32 %v790_v53, %v307_v51  ;;  %v308_v3 = vmul.f32 %v790_v53, %v306_v55 }
  0xa9   : > { %v301_v61 = vadd.f32 %v299_v56, %v291_v57  ;;  %v300_v63 = vadd.f32 %v298_v58, %v290_v59 }
  0xab   : > { %v311_v5 = vadd.f32 %v309_v62, %v301_v61  ;;  %v310_v8 = vadd.f32 %v308_v3, %v300_v63 }
  0xad   : > { %v317_v9 = vadd.f32 %v1040_v17, %v311_v5  ;;  %v316_v10 = vadd.f32 %v314_v19, %v310_v8 }
  0xaf   : > { %v319_v12 = vmul.f32 %v1061_v7, %v317_v9  ;;  %v318_v13 = vmul.f32 %v1061_v7, %v316_v10 }
  0xb1   : > { %v323_v6 = vrot.slane %v319_v12, 1  ;;  %v331_v14 = vrot.slane %v319_v12, 7  ;;  %v322_v11 = vrot.slane %v318_v13, 1  ;;  %v330_v15 = vrot.slane %v318_v13, 7 }
  0xb2   : > { %v320_v18 = vmul.f32 2.0, %v318_v13  ;;  %v321_v25 = vmul.f32 2.0, %v319_v12  ;;  %v341_v27 = vmul.f32 %v1017_v60, %v319_v12  ;;  %v363_v28 = vmul.f32 %v361_v16, %v318_v13 }
  0xb3   : > { %v325_v20 = vsel %vm196_vm2, %v323_v6, %v322_v11  ;;  %v332_v21 = vsel %vm203_vm3, %v330_v15, %v331_v14  ;;  %v324_v17 = vsel %vm196_vm2, %v322_v11, %v323_v6  ;;  %v333_v19 = vsel %vm203_vm3, %v331_v14, %v330_v15 }
  0xb4   : > { %v327_v22 = vmul.f32 %v1006_v40, %v325_v20  ;;  %v334_v23 = vmul.f32 %v972_v4, %v333_v19  ;;  %v328_v26 = vadd.f32 %v324_v17, %v320_v18  ;;  %v340_v29 = vmul.f32 %v997_v24, %v318_v13 }
  0xb6   : > { %v360_v30 = vsub.f32 %v327_v22, %v332_v21  ;;  %v359_v32 = vsub.f32 %v324_v17, %v334_v23  ;;  %v329_v33 = vadd.f32 %v327_v22, %v321_v25  ;;  %v336_v34 = vadd.f32 %v334_v23, %v328_v26 }
  0xb8   : > { %v366_v35 = vadd.f32 %v360_v30, %v341_v27  ;;  %v365_v36 = vadd.f32 %v363_v28, %v359_v32  ;;  %v337_v37 = vadd.f32 %v332_v21, %v329_v33  ;;  %v342_v38 = vadd.f32 %v340_v29, %v336_v34 }
  0xba   : > { %371 = vrot.lane.b32.xlu1 %v366_v35, %s929_s16  ;;  %369 = vrot.lane.b32.xlu0 %v365_v36, %s929_s16  ;;  %v343_v39 = vadd.f32 %v341_v27, %v337_v37  ;;  %v355_v50 = vmul.f32 %v354_v43, %v342_v38  ;;  %v368_v51 = vmul.f32 2.0, %v366_v35  ;;  %v367_v52 = vmul.f32 2.0, %v365_v36 }
  0xbb   : > { %v383_v62 = vmul.f32 %v381_v46, %v366_v35  ;;  %v382_v5 = vmul.f32 %v381_v46, %v365_v36 }
  0xbc   : > { %v356_v48 = vmul.f32 %v354_v43, %v343_v39 }
  0xbe   : > { %346 = vrot.lane.b32.xlu1 %v343_v39, %s929_s16  ;;  %344 = vrot.lane.b32.xlu0 %v342_v38, %s929_s16 }
  0xc2   : > { %350 = vrot.lane.b32.xlu1 %v343_v39, %s928_s15  ;;  %348 = vrot.lane.b32.xlu0 %v342_v38, %s928_s15 }
  0xc6   : > { %377 = vrot.lane.b32.xlu1 %v366_v35, %s928_s15  ;;  %375 = vrot.lane.b32.xlu0 %v365_v36, %s928_s15 }
 0x12c   : > { %v372_v24 = vpop.permute.xlu1 %371  ;;  %v370_v60 = vpop.permute.xlu0 %369 }
 0x12d   : > { %v374_v56 = vadd.f32 %v372_v24, %v368_v51  ;;  %v373_v57 = vadd.f32 %v370_v60, %v367_v52 }
 0x130   : > { %v347_v41 = vpop.permute.xlu1 %346  ;;  %v345_v42 = vpop.permute.xlu0 %344 }
 0x134   : > { %v351_v44 = vpop.permute.xlu1 %350  ;;  %v349_v45 = vpop.permute.xlu0 %348 }
 0x135   : > { %v353_v47 = vsub.f32 %v347_v41, %v351_v44  ;;  %v352_v49 = vsub.f32 %v345_v42, %v349_v45 }
 0x137   : > { %v358_v54 = vadd.f32 %v356_v48, %v353_v47  ;;  %v357_v55 = vadd.f32 %v355_v50, %v352_v49 }
 0x138   : > { %v378_v58 = vpop.permute.xlu1 %377  ;;  %v376_v59 = vpop.permute.xlu0 %375 }
 0x139   : > { %v455_v61 = vand.u32 2147483647, %v358_v54  ;;  %v454_v63 = vand.u32 2147483647, %v357_v55  ;;  %v380_v3 = vadd.f32 %v378_v58, %v374_v56  ;;  %v379_v8 = vadd.f32 %v376_v59, %v373_v57 }
 0x13a   : > { %v387_v9 = vmul.f32 %v358_v54, %v358_v54  ;;  %vm469_vm0 = vcmp.gt.f32.partialorder %v358_v54, 0.0  ;;  %v386_v13 = vmul.f32 %v357_v55, %v357_v55  ;;  %vm468_vm4 = vcmp.gt.f32.partialorder %v357_v55, 0.0 }
 0x13b   : > { %v385_v31 = vadd.f32 %v383_v62, %v380_v3  ;;  %v384_v53 = vadd.f32 %v382_v5, %v379_v8  ;;  %v459_v10 = vmul.f32 0.41421357, %v455_v61  ;;  %v463_v12 = vmul.f32 2.4142137, %v455_v61 }
 0x13c   : > { %v458_v6 = vmul.f32 0.41421357, %v454_v63  ;;  %v462_v16 = vmul.f32 2.4142137, %v454_v63 }
 0x13d   : > { %v389_v14 = vmul.f32 %v385_v31, %v385_v31  ;;  %v457_v11 = vand.u32 2147483647, %v385_v31  ;;  %vm467_vm1 = vcmp.gt.f32.partialorder %v385_v31, 0.0  ;;  %v388_v15 = vmul.f32 %v384_v53, %v384_v53 }
 0x13e   : > { %vm1089_vm5 = vmxor %vm467_vm1, %vm469_vm0  ;;  %v456_v20 = vand.u32 2147483647, %v384_v53  ;;  %vm466_vm6 = vcmp.gt.f32.partialorder %v384_v53, 0.0  ;;  %vm932_vm0 = vmmov 1  }
 0x13f   : > { %v391_v21 = vadd.f32 %v389_v14, %v387_v9  ;;  %vm1093_vm7 = vcmp.ge.f32.partialorder %v457_v11, %v463_v12  ;;  %v390_v19 = vadd.f32 %v388_v15, %v386_v13  ;;  %vm1097_vm8 = vmxor %vm466_vm6, %vm468_vm4  ;;  %vm1101_vm9 = vcmp.le.f32.partialorder %v457_v11, %v459_v10 }
 0x140   : > { %vm1105_vm10 = vcmp.ge.f32.partialorder %v456_v20, %v462_v16  ;;  %vm1109_vm11 = vcmp.le.f32.partialorder %v456_v20, %v458_v6  ;;  %vm473_vm1 = vmxor %vm1089_vm5, %vm932_vm0 }
 0x141   : > { %v393_v27 = vadd.f32 1e-06, %v391_v21  ;;  %v392_v28 = vadd.f32 1e-06, %v390_v19  ;;  %vm472_vm4 = vmxor %vm1097_vm8, %vm932_vm0 }
 0x143   : > { %875 = vrsqrt.f32 %v393_v27  ;;  %vm403_vm12 = vcmp.eq.f32.partialorder %v393_v27, inf  ;;  %v406_v33 = vand.u32 2147483648, %v393_v27  ;;  %vm405_vm13 = vcmp.eq.f32.partialorder %v393_v27, 0.0 }
 0x144   : > { %877 = vrsqrt.f32 %v392_v28  ;;  %vm396_vm14 = vcmp.eq.f32.partialorder %v392_v28, inf  ;;  %v399_v36 = vand.u32 2147483648, %v392_v28  ;;  %vm398_vm15 = vcmp.eq.f32.partialorder %v392_v28, 0.0 }
 0x14d   : > { %v876_v29 = vpop.eup %875 }
 0x14e   : > { %v878_v30 = vpop.eup %877  ;;  %v402_v32 = vmul.f32 %v876_v29, %v393_v27 }
 0x14f   : > { %v395_v34 = vmul.f32 %v878_v30, %v392_v28 }
 0x150   : > { %v404_v35 = vsel %vm403_vm12, %v393_v27, %v402_v32 }
 0x151   : > { %v407_v37 = vsel %vm405_vm13, %v406_v33, %v404_v35  ;;  %v397_v38 = vsel %vm396_vm14, %v392_v28, %v395_v34 }
 0x152   : > { %v409_v39 = vmul.f32 %v1061_v7, %v407_v37  ;;  %v400_v24 = vsel %vm398_vm15, %v399_v36, %v397_v38 }
 0x153   : > { %v408_v60 = vmul.f32 %v1061_v7, %v400_v24 }
 0x154   : > { %424 = vrot.lane.b32.xlu1 %v409_v39, %s929_s16  ;;  %v411_v41 = vrot.slane %v409_v39, 7  ;;  %v417_v42 = vrot.slane %v409_v39, 1 }
 0x155   : > { %422 = vrot.lane.b32.xlu0 %v408_v60, %s929_s16  ;;  %v416_v43 = vrot.slane %v408_v60, 1  ;;  %v410_v44 = vrot.slane %v408_v60, 7 }
 0x157   : > { %v418_v45 = vsel %vm196_vm2, %v416_v43, %v417_v42  ;;  %v413_v46 = vsel %vm203_vm3, %v411_v41, %v410_v44  ;;  %v412_v47 = vsel %vm203_vm3, %v410_v44, %v411_v41  ;;  %v419_v7 = vsel %vm196_vm2, %v417_v42, %v416_v43 }
 0x158   : > { %v414_v48 = vmul.f32 %v972_v4, %v413_v46  ;;  %v421_v49 = vmul.f32 %v1006_v40, %v419_v7  ;;  %440 = vrot.lane.b32.xlu1 %v412_v47, %s928_s15 }
 0x159   : > { %434 = vrot.lane.b32.xlu0 %v418_v45, %s929_s16 }
 0x15a   : > { %v432_v50 = vmax.f32 %v418_v45, %v414_v48  ;;  %v433_v51 = vmax.f32 %v421_v49, %v412_v47 }
 0x15c   : > { %450 = vrot.lane.b32.xlu1 %v412_v47, %s929_s16 }
 0x15d   : > { %444 = vrot.lane.b32.xlu0 %v418_v45, %s928_s15 }
 0x160   : > { %436 = vrot.lane.b32.xlu1 %v421_v49, %s929_s16 }
 0x161   : > { %438 = vrot.lane.b32.xlu0 %v414_v48, %s928_s15 }
 0x164   : > { %446 = vrot.lane.b32.xlu1 %v421_v49, %s928_s15 }
 0x165   : > { %448 = vrot.lane.b32.xlu0 %v414_v48, %s929_s16 }
 0x168   : > { %428 = vrot.lane.b32.xlu1 %v409_v39, %s928_s15 }
 0x169   : > { %426 = vrot.lane.b32.xlu0 %v408_v60, %s928_s15 }
 0x1c6   : > { %v425_v52 = vpop.permute.xlu1 %424 }
 0x1c7   : > { %v423_v54 = vpop.permute.xlu0 %422 }
 0x1ca   : > { %v441_v55 = vpop.permute.xlu1 %440 }
 0x1cb   : > { %v435_v56 = vpop.permute.xlu0 %434 }
 0x1ce   : > { %v451_v57 = vpop.permute.xlu1 %450 }
 0x1cf   : > { %v445_v58 = vpop.permute.xlu0 %444 }
 0x1d2   : > { %v437_v59 = vpop.permute.xlu1 %436 }
 0x1d3   : > { %v439_v61 = vpop.permute.xlu0 %438  ;;  %v443_v63 = vmax.f32 %v437_v59, %v441_v55 }
 0x1d4   : > { %v442_v8 = vmax.f32 %v435_v56, %v439_v61 }
 0x1d6   : > { %v447_v62 = vpop.permute.xlu1 %446 }
 0x1d7   : > { %v449_v3 = vpop.permute.xlu0 %448  ;;  %v453_v5 = vmax.f32 %v447_v62, %v451_v57 }
 0x1d8   : > { %v452_v9 = vmax.f32 %v445_v58, %v449_v3 }
 0x1d9   : > { %v475_v31 = vsel %vm473_vm1, %v443_v63, %v453_v5 }
 0x1da   : > { %v474_v53 = vsel %vm472_vm4, %v442_v8, %v452_v9  ;;  %v429_v10 = vpop.permute.xlu1 %428  ;;  %v477_v12 = vsel %vm1093_vm7, %v433_v51, %v475_v31 }
 0x1db   : > { %v427_v13 = vpop.permute.xlu0 %426  ;;  %v476_v6 = vsel %vm1105_vm10, %v432_v50, %v474_v53  ;;  %v431_v14 = vmax.f32 %v425_v52, %v429_v10 }
 0x1dc   : > { %v430_v11 = vmax.f32 %v423_v54, %v427_v13 }
 0x1dd   : > { %v479_v15 = vsel %vm1101_vm9, %v431_v14, %v477_v12 }
 0x1de   : > { %v478_v16 = vsel %vm1109_vm11, %v430_v11, %v476_v6  ;;  %vm481_vm5 = vcmp.gt.f32.partialorder %v409_v39, %v479_v15 }
 0x1df   : > { %vm480_vm6 = vcmp.gt.f32.partialorder %v408_v60, %v478_v16  ;;  %v795_v18 = vsel %vm481_vm5, 1.0, %v927_v2 }
 0x1e0   : > { %v794_v20 = vsel %vm480_vm6, 1.0, %v927_v2  ;;  %v487_v21 = vmul.f32 %v795_v18, %v409_v39 }
 0x1e1   : > { %v486_v17 = vmul.f32 %v794_v20, %v408_v60 }
 0x1e2   : > { %vm489_vm7 = vcmp.gt.f32.partialorder %v487_v21, 0.2  ;;  %vm495_vm8 = vcmp.gt.f32.partialorder %v487_v21, 0.1 }
 0x1e3   : > { %vm488_vm12 = vcmp.gt.f32.partialorder %v486_v17, 0.2  ;;  %v797_v19 = vsel %vm489_vm7, 1.0, %v927_v2   ;;  %vm494_vm10 = vcmp.gt.f32.partialorder %v486_v17, 0.1  ;;  %v799_v22 = vsel %vm495_vm8, 1.0, %v927_v2 }
 0x1e4   : > { %v796_v23 = vsel %vm488_vm12, 1.0, %v927_v2   ;;  %v798_v25 = vsel %vm494_vm10, 1.0, %v927_v2  ;;  %v1155_v26 = vsub.f32 %v799_v22, %v797_v19  ;;  %v1283_v37 = vmov %v797_v19 }
 0x1e5   : > { %v1157_v27 = vsub.f32 %v798_v25, %v796_v23  ;;  %v502_v28 = vadd.f32 %v797_v19, %v796_v23  ;;  %v1284_v2 = vmov %v796_v23 }
 0x1e7   : > { %503 = vadd.xlane.f32.xlu0 %v502_v28 }
 0x274   : > { %v504_v29 = vpop.xlane.xlu0 %503 }
 0x275   : > { %v505_v30 = vrot.slane %v504_v29, 4 }
 0x277   : > { %v506_v32 = vadd.f32 %v505_v30, %v504_v29 }
 0x279   : > { %v507_v33 = vrot.slane %v506_v32, 2 }
 0x27b   : > { %v508_v34 = vadd.f32 %v507_v33, %v506_v32 }
 0x27d   : > { %v509_v35 = vrot.slane %v508_v34, 1 }
 0x27f   : > { %v510_v36 = vadd.f32 %v509_v35, %v508_v34 }
 0x281   : > { %811 = vpush %v510_v36 }
 0x2b2   : > { %s812_s19 = spop %811  }
 0x2b3   : > { %p745_p4 = scmp.gt.f32.partialorder %s812_s19, -1.0 }
 0x2b5   : > { %747 = sbr.rel (!%p745_p4) target bundleno = 1469 (0x5bd), region = 55 }
 0x2bc LB: >> { %v521_v38 = vrot.slane %v917_v23, 7  ;;  %v522_v39 = vrot.slane %v913_v19, 7  ;;  %v529_v24 = vrot.slane %v917_v23, 1  ;;  %v530_v60 = vrot.slane %v913_v19, 1  ;;  %s933_s20 = smov 1   ;;  %s934_s21 = smov 127   ;;  %v917_v23 = vphi %v796_v23, %v1287_v23   ;;  %v913_v19 = vphi %v797_v19, %v1286_v19   ;;  %s909_s19 = sphi %s812_s19, %s1285_s19  }
 0x2bd   : >> { %v935_v61 = vmov 0.0  }
 0x2be   : >> { %v524_v41 = vsel %vm203_vm3, %v522_v39, %v521_v38  ;;  %v523_v42 = vsel %vm203_vm3, %v521_v38, %v522_v39  ;;  %v532_v43 = vsel %vm196_vm2, %v530_v60, %v529_v24  ;;  %v531_v45 = vsel %vm196_vm2, %v529_v24, %v530_v60 }
 0x2bf   : >> { %v525_v44 = vmul.f32 %v972_v4, %v524_v41  ;;  %v528_v47 = vadd.f32 %v913_v19, %v523_v42  ;;  %v534_v7 = vmul.f32 %v1006_v40, %v532_v43 }
 0x2c1   : >> { %v527_v46 = vadd.f32 %v917_v23, %v525_v44  ;;  %v536_v49 = vadd.f32 %v534_v7, %v528_v47 }
 0x2c3   : >> { %v535_v48 = vadd.f32 %v531_v45, %v527_v46 }
 0x2c5   : >> { %537 = vrot.lane.b32.xlu0 %v535_v48, %s933_s20  ;;  %543 = vrot.lane.b32.xlu1 %v535_v48, %s934_s21 }
 0x2c9   : >> { %539 = vrot.lane.b32.xlu0 %v536_v49, %s933_s20  ;;  %545 = vrot.lane.b32.xlu1 %v536_v49, %s934_s21 }
 0x337   : >> { %v538_v50 = vpop.permute.xlu0 %537  ;;  %v544_v51 = vpop.permute.xlu1 %543 }
 0x338   : >> { %v541_v52 = vadd.f32 %v538_v50, %v535_v48 }
 0x33a   : >> { %v547_v54 = vadd.f32 %v544_v51, %v541_v52 }
 0x33b   : >> { %v540_v55 = vpop.permute.xlu0 %539  ;;  %v546_v56 = vpop.permute.xlu1 %545 }
 0x33c   : >> { %v549_v57 = vsub.f32 %v547_v54, %v917_v23  ;;  %v542_v58 = vadd.f32 %v540_v55, %v536_v49 }
 0x33e   : >> { %vm551_vm9 = vcmp.gt.f32.partialorder %v549_v57, 0.5  ;;  %v548_v59 = vadd.f32 %v546_v56, %v542_v58 }
 0x33f   : >> { %v800_v62 = vsel %vm551_vm9, 1.0, %v935_v61 }
 0x340   : >> { %v557_v63 = vmul.f32 %v800_v62, %v1157_v27  ;;  %v550_v3 = vsub.f32 %v548_v59, %v913_v19 }
 0x342   : >> { %vm552_vm11 = vcmp.gt.f32.partialorder %v550_v3, 0.5  ;;  %v559_v8 = vmax.f32 %v917_v23, %v557_v63 }
 0x343   : >> { %v801_v5 = vsel %vm552_vm11, 1.0, %v935_v61 }
 0x344   : >> { %v558_v9 = vmul.f32 %v801_v5, %v1155_v26  ;;  %v561_v53 = vrot.slane %v559_v8, 7  ;;  %v569_v12 = vrot.slane %v559_v8, 1 }
 0x346   : >> { %v560_v31 = vmax.f32 %v913_v19, %v558_v9 }
 0x348   : >> { %v562_v10 = vrot.slane %v560_v31, 7  ;;  %v570_v13 = vrot.slane %v560_v31, 1 }
 0x34a   : >> { %v563_v6 = vsel %vm203_vm3, %v561_v53, %v562_v10  ;;  %v572_v14 = vsel %vm196_vm2, %v570_v13, %v569_v12  ;;  %v564_v11 = vsel %vm203_vm3, %v562_v10, %v561_v53  ;;  %v571_v17 = vsel %vm196_vm2, %v569_v12, %v570_v13 }
 0x34b   : >> { %v568_v15 = vadd.f32 %v563_v6, %v560_v31  ;;  %v574_v16 = vmul.f32 %v1006_v40, %v572_v14  ;;  %v565_v18 = vmul.f32 %v972_v4, %v564_v11 }
 0x34d   : >> { %v576_v20 = vadd.f32 %v574_v16, %v568_v15  ;;  %v567_v21 = vadd.f32 %v565_v18, %v559_v8 }
 0x34f   : >> { %579 = vrot.lane.b32.xlu1 %v576_v20, %s933_s20  ;;  %v575_v19 = vadd.f32 %v571_v17, %v567_v21 }
 0x351   : >> { %577 = vrot.lane.b32.xlu0 %v575_v19, %s933_s20 }
 0x353   : >> { %585 = vrot.lane.b32.xlu1 %v576_v20, %s934_s21 }
 0x355   : >> { %583 = vrot.lane.b32.xlu0 %v575_v19, %s934_s21 }
 0x3c1   : >> { %v580_v22 = vpop.permute.xlu1 %579 }
 0x3c2   : >> { %v582_v25 = vadd.f32 %v580_v22, %v576_v20 }
 0x3c3   : >> { %v578_v23 = vpop.permute.xlu0 %577 }
 0x3c4   : >> { %v581_v29 = vadd.f32 %v578_v23, %v575_v19 }
 0x3c5   : >> { %v586_v28 = vpop.permute.xlu1 %585 }
 0x3c6   : >> { %v588_v30 = vadd.f32 %v586_v28, %v582_v25 }
 0x3c7   : >> { %v584_v32 = vpop.permute.xlu0 %583 }
 0x3c8   : >> { %v590_v33 = vsub.f32 %v588_v30, %v560_v31  ;;  %v587_v34 = vadd.f32 %v584_v32, %v581_v29 }
 0x3ca   : >> { %vm592_vm13 = vcmp.gt.f32.partialorder %v590_v33, 0.5  ;;  %v589_v35 = vsub.f32 %v587_v34, %v559_v8 }
 0x3cb   : >> { %v803_v36 = vsel %vm592_vm13, 1.0, %v935_v61 }
 0x3cc   : >> { %v598_v37 = vmul.f32 %v803_v36, %v1155_v26  ;;  %vm591_vm14 = vcmp.gt.f32.partialorder %v589_v35, 0.5 }
 0x3cd   : >> { %v802_v2 = vsel %vm591_vm14, 1.0, %v935_v61 }
 0x3ce   : >> { %v600_v38 = vmax.f32 %v560_v31, %v598_v37  ;;  %v597_v39 = vmul.f32 %v802_v2, %v1157_v27 }
 0x3d0   : >> { %v599_v24 = vmax.f32 %v559_v8, %v597_v39  ;;  %v602_v41 = vrot.slane %v600_v38, 7  ;;  %v610_v43 = vrot.slane %v600_v38, 1 }
 0x3d2   : >> { %v601_v60 = vrot.slane %v599_v24, 7  ;;  %v609_v42 = vrot.slane %v599_v24, 1 }
 0x3d4   : >> { %v603_v44 = vsel %vm203_vm3, %v601_v60, %v602_v41  ;;  %v612_v45 = vsel %vm196_vm2, %v610_v43, %v609_v42  ;;  %v604_v46 = vsel %vm203_vm3, %v602_v41, %v601_v60  ;;  %v611_v51 = vsel %vm196_vm2, %v609_v42, %v610_v43 }
 0x3d5   : >> { %v608_v47 = vadd.f32 %v603_v44, %v600_v38  ;;  %v614_v7 = vmul.f32 %v1006_v40, %v612_v45  ;;  %v605_v48 = vmul.f32 %v972_v4, %v604_v46 }
 0x3d7   : >> { %v616_v49 = vadd.f32 %v614_v7, %v608_v47  ;;  %v607_v50 = vadd.f32 %v605_v48, %v599_v24 }
 0x3d9   : >> { %619 = vrot.lane.b32.xlu1 %v616_v49, %s933_s20  ;;  %v615_v52 = vadd.f32 %v611_v51, %v607_v50 }
 0x3db   : >> { %617 = vrot.lane.b32.xlu0 %v615_v52, %s933_s20 }
 0x3dd   : >> { %625 = vrot.lane.b32.xlu1 %v616_v49, %s934_s21 }
 0x3df   : >> { %623 = vrot.lane.b32.xlu0 %v615_v52, %s934_s21 }
 0x44b   : >> { %v620_v54 = vpop.permute.xlu1 %619 }
 0x44c   : >> { %v622_v56 = vadd.f32 %v620_v54, %v616_v49 }
 0x44d   : >> { %v618_v55 = vpop.permute.xlu0 %617 }
 0x44e   : >> { %v621_v58 = vadd.f32 %v618_v55, %v615_v52 }
 0x44f   : >> { %v626_v57 = vpop.permute.xlu1 %625 }
 0x450   : >> { %v628_v59 = vadd.f32 %v626_v57, %v622_v56 }
 0x451   : >> { %v624_v62 = vpop.permute.xlu0 %623 }
 0x452   : >> { %v630_v63 = vsub.f32 %v628_v59, %v600_v38  ;;  %v627_v3 = vadd.f32 %v624_v62, %v621_v58 }
 0x454   : >> { %vm632_vm15 = vcmp.gt.f32.partialorder %v630_v63, 0.5  ;;  %v629_v5 = vsub.f32 %v627_v3, %v599_v24 }
 0x455   : >> { %v805_v8 = vsel %vm632_vm15, 1.0, %v935_v61 }
 0x456   : >> { %v638_v9 = vmul.f32 %v805_v8, %v1155_v26  ;;  %vm631_vm0 = vcmp.gt.f32.partialorder %v629_v5, 0.5 }
 0x457   : >> { %v804_v31 = vsel %vm631_vm0, 1.0, %v935_v61 }
 0x458   : >> { %v640_v53 = vmax.f32 %v600_v38, %v638_v9  ;;  %v637_v10 = vmul.f32 %v804_v31, %v1157_v27 }
 0x45a   : >> { %v639_v12 = vmax.f32 %v599_v24, %v637_v10  ;;  %v642_v6 = vrot.slane %v640_v53, 7  ;;  %v650_v11 = vrot.slane %v640_v53, 1 }
 0x45c   : >> { %v641_v13 = vrot.slane %v639_v12, 7  ;;  %v649_v14 = vrot.slane %v639_v12, 1 }
 0x45e   : >> { %v643_v15 = vsel %vm203_vm3, %v641_v13, %v642_v6  ;;  %v652_v16 = vsel %vm196_vm2, %v650_v11, %v649_v14  ;;  %v644_v18 = vsel %vm203_vm3, %v642_v6, %v641_v13  ;;  %v651_v23 = vsel %vm196_vm2, %v649_v14, %v650_v11 }
 0x45f   : >> { %v648_v20 = vadd.f32 %v643_v15, %v640_v53  ;;  %v654_v21 = vmul.f32 %v1006_v40, %v652_v16  ;;  %v645_v17 = vmul.f32 %v972_v4, %v644_v18 }
 0x461   : >> { %v656_v19 = vadd.f32 %v654_v21, %v648_v20  ;;  %v647_v22 = vadd.f32 %v645_v17, %v639_v12 }
 0x463   : >> { %659 = vrot.lane.b32.xlu1 %v656_v19, %s933_s20  ;;  %v655_v25 = vadd.f32 %v651_v23, %v647_v22 }
 0x465   : >> { %657 = vrot.lane.b32.xlu0 %v655_v25, %s933_s20 }
 0x467   : >> { %665 = vrot.lane.b32.xlu1 %v656_v19, %s934_s21 }
 0x469   : >> { %663 = vrot.lane.b32.xlu0 %v655_v25, %s934_s21 }
 0x4d5   : >> { %v660_v28 = vpop.permute.xlu1 %659 }
 0x4d6   : >> { %v662_v30 = vadd.f32 %v660_v28, %v656_v19 }
 0x4d7   : >> { %v658_v29 = vpop.permute.xlu0 %657 }
 0x4d8   : >> { %v661_v33 = vadd.f32 %v658_v29, %v655_v25 }
 0x4d9   : >> { %v666_v32 = vpop.permute.xlu1 %665 }
 0x4da   : >> { %v668_v34 = vadd.f32 %v666_v32, %v662_v30 }
 0x4db   : >> { %v664_v35 = vpop.permute.xlu0 %663 }
 0x4dc   : >> { %v670_v36 = vsub.f32 %v668_v34, %v640_v53  ;;  %v667_v37 = vadd.f32 %v664_v35, %v661_v33 }
 0x4de   : >> { %vm672_vm1 = vcmp.gt.f32.partialorder %v670_v36, 0.5  ;;  %v669_v2 = vsub.f32 %v667_v37, %v639_v12 }
 0x4df   : >> { %v807_v38 = vsel %vm672_vm1, 1.0, %v935_v61 }
 0x4e0   : >> { %v678_v39 = vmul.f32 %v807_v38, %v1155_v26  ;;  %vm671_vm4 = vcmp.gt.f32.partialorder %v669_v2, 0.5 }
 0x4e1   : >> { %v806_v24 = vsel %vm671_vm4, 1.0, %v935_v61 }
 0x4e2   : >> { %v677_v60 = vmul.f32 %v806_v24, %v1157_v27  ;;  %v680_v42 = vmax.f32 %v640_v53, %v678_v39  }
 0x4e4   : >> { %v679_v41 = vmax.f32 %v639_v12, %v677_v60   ;;  %v1286_v19 = vmov %v680_v42 }
 0x4e6   : >> { %v681_v43 = vadd.f32 %v680_v42, %v679_v41  ;;  %v1287_v23 = vmov %v679_v41 }
 0x4e8   : >> { %682 = vadd.xlane.f32.xlu0 %v681_v43 }
 0x575   : >> { %v683_v44 = vpop.xlane.xlu0 %682 }
 0x576   : >> { %v684_v45 = vrot.slane %v683_v44, 4 }
 0x578   : >> { %v685_v46 = vadd.f32 %v684_v45, %v683_v44 }
 0x57a   : >> { %v686_v47 = vrot.slane %v685_v46, 2 }
 0x57c   : >> { %v687_v7 = vadd.f32 %v686_v47, %v685_v46 }
 0x57e   : >> { %v688_v48 = vrot.slane %v687_v7, 1 }
 0x580   : >> { %v689_v49 = vadd.f32 %v688_v48, %v687_v7 }
 0x582   : >> { %813 = vpush %v689_v49 }
 0x5b3   : >> { %s814_s22 = spop %813  }
 0x5b4   : >> { %p517_p5 = scmp.gt.f32.partialorder %s814_s22, %s909_s19  ;;  %s1285_s19 = smov %s814_s22 }
 0x5b5   : > { %v1288_v37 = vmov (!%p517_p5), %v680_v42  ;;  %v1289_v2 = vmov (!%p517_p5), %v679_v41 }
 0x5b6   : > { %520 = sbr.rel (%p517_p5) target bundleno = 700 (0x2bc), region = 61 }
 0x5bd PF: > { %s936_s23 = smov 110   ;;  %vm712_vm2 = vcmask 0   ;;  %v925_v2 = vphi %v1284_v2, %v1289_v2   ;;  %v921_v37 = vphi %v1283_v37, %v1288_v37  }
 0x5be   : > { %691 = vrot.lane.b32.xlu0 %v925_v2, %s936_s23 }
 0x5c2   : > { %693 = vrot.lane.b32.xlu0 %v921_v37, %s936_s23 }
 0x630   : > { %v692_v61 = vpop.permute.xlu0 %691 }
 0x631   : > { %v695_v50 = vsub.f32 %v925_v2, %v692_v61 }
 0x633   : > { %v697_v52 = vmul.f32 %v1035_v0, %v695_v50 }
 0x634   : > { %v694_v51 = vpop.permute.xlu0 %693 }
 0x635   : > { %v696_v54 = vsub.f32 %v921_v37, %v694_v51  ;;  %v699_v4 = vmul.f32 %v697_v52, %v697_v52 }
 0x637   : > { %v698_v1 = vmul.f32 %v1035_v0, %v696_v54 }
 0x639   : > { %v700_v40 = vmul.f32 %v698_v1, %v698_v1 }
 0x63b   : > { %v701_v26 = vadd.f32 %v700_v40, %v699_v4 }
 0x63d   : > { %702 = vadd.xlane.f32.xlu1 %v701_v26 }
 0x6ca   : > { %v703_v27 = vpop.xlane.xlu1 %702 }
 0x6cb   : > { %v704_v55 = vrot.slane %v703_v27, 4 }
 0x6cd   : > { %v705_v56 = vadd.f32 %v704_v55, %v703_v27 }
 0x6cf   : > { %v706_v57 = vrot.slane %v705_v56, 2 }
 0x6d1   : > { %v707_v58 = vadd.f32 %v706_v57, %v705_v56 }
 0x6d3   : > { %v708_v59 = vrot.slane %v707_v58, 1 }
 0x6d5   : > { %v709_v62 = vadd.f32 %v708_v59, %v707_v58 }
 0x6d7   : > { %815 = vpush %v709_v62 }
 0x708   : > { %s816_s24 = spop %815 }
 0x709   : > { %v711_v63 = vstv %s816_s24 }
 0x70a   : > { %713 = vst.msk [vmem:[%s112_s11] sm:$0x1] %vm712_vm2, %v711_v63 }
 0x70b PF: > { %s11_s6 = sadd.s32 1, %s905_s6  }
 0x70c   : > { %p8_p6 = scmp.ge.s32.totalorder %s11_s6, 4  }
 0x70e   :  { %10 = sbr.rel (!%p8_p6) target bundleno = 1 (0x1), region = 72 }

</bundles_post_ra>
